<compile_context>
chip_gen: v7x
topology: tpu7x:2x2x1
jax: 0.10.0
libtpu: 0.0.40
codegen_flags: <defaults>
</compile_context>

<pallas_src>
import jax
import jax.numpy as jnp
from jax import lax
from jax.experimental import pallas as pl
from jax.experimental.pallas import tpu as pltpu


def op_selector_kernel(w_ref, x_ref, o_ref):
    """Fused: hard one-hot(argmax W) mask -> linear (x @ mask.T), one batch tile."""
    w = w_ref[...]                                           # (Y, X) f32, resident tile

    # First-occurrence row-wise argmax (matches torch argmax + scatter semantics).
    amax = jnp.argmax(w, axis=1)                             # (Y,)
    col = lax.broadcasted_iota(jnp.int32, w.shape, 1)        # (Y, X) column indices
    mask = (col == amax[:, None]).astype(jnp.bfloat16)       # exact one-hot in bf16

    # x is binary, mask is one-hot -> bf16 operands are exact; accumulate in f32.
    x = x_ref[...].astype(jnp.bfloat16)                      # (TB, X)

    # out[b, y] = sum_x x[b, x] * mask[y, x] ; contract last dims, no transpose.
    o_ref[...] = lax.dot_general(
        x, mask,
        dimension_numbers=(((1,), (1,)), ((), ())),
        preferred_element_type=jnp.float32,
    ).astype(o_ref.dtype)


def op_selector_forward(x, w, *, tb=128):
    """x: (B, in_features) float32 (binary), w: (out_features, in_features) float32."""
    B, X = x.shape
    Y, Xw = w.shape
    assert X == Xw, "in_features mismatch"
    tb = min(tb, B)
    assert B % tb == 0, "batch must be divisible by the batch tile"
    grid = (B // tb,)

    return pl.pallas_call(
        op_selector_kernel,
        out_shape=jax.ShapeDtypeStruct((B, Y), jnp.float32),
        grid_spec=pltpu.PrefetchScalarGridSpec(
            num_scalar_prefetch=0,
            grid=grid,
            in_specs=[
                # Weight: same block every step -> stays resident in VMEM (no re-DMA).
                pl.BlockSpec((Y, X), lambda i: (0, 0)),
                # Input: one batch tile per grid step (double-buffered by Pallas).
                pl.BlockSpec((tb, X), lambda i: (i, 0)),
            ],
            out_specs=pl.BlockSpec((tb, Y), lambda i: (i, 0)),
        ),
        compiler_params=pltpu.CompilerParams(
            dimension_semantics=("parallel",),   # batch tiles are independent
        ),
    )(w, x)


def xavier_uniform(key, out_features, in_features):
    # torch.nn.init.xavier_uniform_ : U(-a, a), a = sqrt(6 / (fan_in + fan_out))
    bound = (6.0 / (in_features + out_features)) ** 0.5
    return jax.random.uniform(key, (out_features, in_features),
                              minval=-bound, maxval=bound, dtype=jnp.float32)


if __name__ == "__main__":
    in_features = 128    # "x" in Op_Selector(x, y) -- 128-multiple: lane-dense / MXU-aligned
    out_features = 128   # "y" in Op_Selector(x, y) -- lane-dense output stores
    batch = 256          # two batch tiles of 128 -> exercises the grid / pipelining

    key = jax.random.PRNGKey(0)
    k_w, k_x = jax.random.split(key)

    # Deterministic Xavier-uniform weight (same shape as nn.Linear(x, y).weight).
    w = xavier_uniform(k_w, out_features, in_features)

    # Binary input so the module's check_binary_tensor assertion semantics hold.
    x = jax.random.bernoulli(k_x, p=0.5, shape=(batch, in_features)).astype(jnp.float32)

    out = jax.block_until_ready(op_selector_forward(x, w))

    # --- reference check in plain JAX (forward value of the STE mask == hard one-hot) ---
    hard_ref = jax.nn.one_hot(jnp.argmax(w, axis=1), in_features, dtype=jnp.float32)
    out_ref = x @ hard_ref.T
    assert out.shape == (batch, out_features)
    assert bool(jnp.array_equal(out, out_ref)), "mismatch vs reference"
    # check_binary_tensor equivalent
    assert bool(jnp.all((out == 0) | (out == 1))), "selector output is not binary"

    print("KERNEL_OK")
</pallas_src>

<mosaic_0001>
module attributes {stable_mosaic.version = 11 : i64} {
  func.func @op_selector_kernel(%arg0: i32, %arg1: memref<128x128xf32, #tpu.memory_space<vmem>>, %arg2: memref<128x128xf32, #tpu.memory_space<vmem>>, %arg3: memref<128x128xf32, #tpu.memory_space<vmem>>) attributes {dimension_semantics = [#tpu.dimension_semantics<parallel>], iteration_bounds = array<i64: 2>, scalar_prefetch = 0 : i64, scratch_operands = 0 : i64, tpu.core_type = #tpu.core_type<tc>, window_params = [{pipeline_mode = #tpu.pipeline_mode<synchronous>, transform_indices = @transform_0, window_bounds = array<i64: 128, 128>}, {transform_indices = @transform_1, window_bounds = array<i64: 128, 128>}, {transform_indices = @transform_2, window_bounds = array<i64: 128, 128>}]} {
    %c0 = arith.constant 0 : index
    %c0_0 = arith.constant 0 : index
    %0 = vector.load %arg1[%c0, %c0_0] : memref<128x128xf32, #tpu.memory_space<vmem>>, vector<128x128xf32>
    %1 = tpu.reduce_index %0 {axis = 1 : i32, kind = #tpu.reduction_kind<arg_max>} : vector<128x128xf32> -> vector<128xi32>
    %2 = tpu.iota {dimensions = array<i32: 1>} : vector<128x128xi32>
    %3 = vector.shape_cast %1 : vector<128xi32> to vector<128x1xi32>
    %4 = vector.broadcast %3 : vector<128x1xi32> to vector<128x128xi32>
    %5 = arith.cmpi eq, %2, %4 : vector<128x128xi32>
    %6 = arith.extui %5 : vector<128x128xi1> to vector<128x128xi32>
    %7 = arith.sitofp %6 : vector<128x128xi32> to vector<128x128xf32>
    %8 = arith.truncf %7 : vector<128x128xf32> to vector<128x128xbf16>
    %c0_1 = arith.constant 0 : index
    %c0_2 = arith.constant 0 : index
    %9 = vector.load %arg2[%c0_1, %c0_2] : memref<128x128xf32, #tpu.memory_space<vmem>>, vector<128x128xf32>
    %10 = arith.truncf %9 : vector<128x128xf32> to vector<128x128xbf16>
    %cst = arith.constant dense<0.000000e+00> : vector<128x128xf32>
    %11 = tpu.matmul %10, %8, %cst {dimension_numbers = #tpu.dot_dimension_numbers<[1], [1], [0], [0], [0, 0, 1, 0], [], []>} : vector<128x128xbf16>, vector<128x128xbf16>, vector<128x128xf32> -> vector<128x128xf32>
    %c0_3 = arith.constant 0 : index
    %c0_4 = arith.constant 0 : index
    %12 = vector.load %arg3[%c0_3, %c0_4] : memref<128x128xf32, #tpu.memory_space<vmem>>, vector<128x128xf32>
    tpu.vector_store %arg3[%c0_3, %c0_4], %11 {strides = array<i32>} : memref<128x128xf32, #tpu.memory_space<vmem>>, vector<128x128xf32>,
    return
  }
  func.func @transform_0(%arg0: i32) -> (i32, i32) {
    %c0_i32 = arith.constant 0 : i32
    %c0_i32_0 = arith.constant 0 : i32
    %c0_i32_1 = arith.constant 0 : i32
    return %c0_i32, %c0_i32_0 : i32, i32
  }
  func.func @transform_1(%arg0: i32) -> (i32, i32) {
    %c0_i32 = arith.constant 0 : i32
    %c0_i32_0 = arith.constant 0 : i32
    return %arg0, %c0_i32 : i32, i32
  }
  func.func @transform_2(%arg0: i32) -> (i32, i32) {
    %c0_i32 = arith.constant 0 : i32
    %c0_i32_0 = arith.constant 0 : i32
    return %arg0, %c0_i32 : i32, i32
  }
}

</mosaic_0001>

<bundles_post_ra>
// kernel: tpu_custom_call.1
= control target key start
LH: loop header
LB: loop body
LE: loop exit
PB: predicated region body
PF: predicated region fallthrough
CT: control target
= control target key end

     0   :  { %7 = vsyncpa [#allocation3], 0  ;;  %s1149_s0 = inlined_call_operand.hbm [shape: f32[128,128], index: 0, kind: input, shape index: {}]   ;;  %s1150_s1 = inlined_call_operand.hbm [shape: f32[256,128], index: 1, kind: input, shape index: {}]   ;;  %s1151_s2 = inlined_call_operand.hbm [shape: f32[256,128], index: 2, kind: output, shape index: {}]  }
   0x1   :  { %8 = vsyncpa [#allocation6], 0 }
   0x2   :  { %10 = vsyncpa [#allocation6 + $0x1], 0 }
   0x3   :  { %11 = vsyncpa [#allocation4], 0 }
   0x4   :  { %13 = vsyncpa [#allocation4 + $0x1], 0  ;;  %s851_s9 = smov 0   ;;  %s853_s10 = smov 0  }
   0x5   :  { %s855_s11 = smov 0   ;;  %s857_s12 = smov 0  }
   0x6 LB: > { %s872_s13 = sadd.s32 4294967295, %s826_s12   ;;  %s522_s14 = sadd.s32 4294967294, %s826_s12   ;;  %s826_s12 = sphi %s857_s12, %s1171_s12   ;;  %s822_s11 = sphi %s855_s11, %s1170_s11   ;;  %s818_s10 = sphi %s853_s10, %s1169_s10   ;;  %s814_s9 = sphi %s851_s9, %s1168_s9  }
   0x7   : > { %p60_p0 = scmp.ne.s32.totalorder %s818_s10, %s814_s9  ;;  %p1152_p1 = scmp.eq.s32.totalorder %s872_s13, 0 }
   0x8   : > { %p90_p3 = scmp.eq.s32.totalorder %s522_s14, 1  ;;  %p523_p5 = scmp.ge.s32.totalorder %s826_s12, 1 }
   0x9   : > { %p881_p4 = por %p1152_p1, %p60_p0  ;;  %p97_p7 = scmp.lt.s32.totalorder %s826_s12, 3 }
   0xa   : > { %p886_p6 = por %p90_p3, %p60_p0  ;;  %s828_s18 = smov [#allocation2]  }
   0xb   : > { %s1155_s15 = scalar_select %p881_p4, 1, 0 }
   0xc   : > { %s1156_s16 = scalar_select %p886_p6, 1, 0 }
   0xd   : > { %p891_p8 = pnand %p523_p5, %p97_p7  ;;  %s109_s19 = sshll.u32 %s828_s18, 4  ;;  %s895_s19 = int_to_ptr.vmem [resolvable:$true] %s109_s19 }
   0xe   : > { %s907_s21 = sadd.s32 1, %s826_s12   ;;  %s47_s22 = sadd.s32 1, %s822_s11 }
   0xf   : > { %s1157_s17 = scalar_select %p891_p8, 1, 0 }
  0x10   : > { %p644_p9 = pneg %p891_p8  ;;  %s44_s23 = ssub.s32 %s826_s12, %s907_s21 }
  0x11   : > { %s698_s26 = scalar_lea.hbm %s1149_s0, 2048 }
  0x12   : > { %p902_p11 = pnand %p644_p9, %p1152_p1  ;;  %p699_p12 = scmp.ne.s32.totalorder %s1149_s0, %s698_s26 }
  0x13   : > { %p705_p5 = scmp.lt.u32.totalorder %s698_s26, %s1149_s0 }
  0x14   : > { %p700_p13 = pneg %p902_p11 }
  0x16   : > { %p701_p0 = pnand %p700_p13, %p699_p12 }
  0x18   : > { %p702_p3 = pneg %p701_p0 }
  0x1a   : > { %p707_p7 = pnand %p705_p5, %p702_p3 }
  0x1c   : > { %710 = shalt.err (!%p707_p7)
}
  0x1d   : > { %s711_s3 = scalar_lea.vmem %s895_s19, 2048  ;;  %p719_p2 = scmp.lt.s32.totalorder %s895_s19, %s895_s19 }
  0x1e   : > { %p712_p9 = scmp.ne.s32.totalorder %s895_s19, %s711_s3  ;;  %p720_p6 = scmp.lt.s32.totalorder %s711_s3, %s711_s3 }
  0x20   : > { %p714_p10 = pnand %p712_p9, %p700_p13  ;;  %p721_p4 = por %p720_p6, %p719_p2 }
  0x22   : > { %p715_p1 = pneg %p714_p10 }
  0x24   : > { %p722_p8 = pnand %p721_p4, %p715_p1 }
  0x26   : > { %725 = shalt.err (!%p722_p8)
}
  0x27   : > { %s829_s4 = smov 128   ;;  %s830_s5 = smov 8  }
  0x28   : > { %647 = dma.hbm_to_vmem [thread:$0]  (!%p902_p11), %s1149_s0, 2048, %s895_s19, [#allocation3], %s829_s4, %s829_s4, %s830_s5  }
  0x29   : > { %p45_p1 = scmp.eq.s32.totalorder %s44_s23, 0  ;;  %p54_p2 = scmp.ne.s32.totalorder %s822_s11, %s818_s10 }
  0x2a   : > { %p55_p4 = scmp.eq.s32.totalorder %s826_s12, 0  ;;  %p657_p6 = scmp.lt.s32.totalorder %s826_s12, 2 }
  0x2b   : > { %s941_s8 = scalar_select %p45_p1, %s822_s11, %s47_s22  }
  0x2c   : > { %p56_p8 = por %p55_p4, %p54_p2  ;;  %p1159_p10 = scmp.eq.s32.totalorder %s872_s13, 1 }
  0x2d   : > { %s123_s18 = sand.u32 1, %s822_s11   ;;  %s570_s20 = sshll.u32 %s826_s12, 11 }
  0x2e   : > { %p945_p12 = por %p1159_p10, %p54_p2  ;;  %s526_s24 = sshll.u32 %s123_s18, 7 }
  0x2f   : > { %s954_s27 = scalar_lea.hbm %s1150_s1, %s570_s20  ;;  %s127_s19 = scalar_lea.vmem [#allocation5], %s526_s24 }
  0x30   : > { %s134_s22 = sshll.u32 %s127_s19, 4  ;;  %p956_p11 = pnand %p657_p6, %p56_p8  ;;  %s960_s22 = int_to_ptr.vmem [resolvable:$true] %s134_s22 }
  0x31   : > { %s962_s28 = scalar_lea.sflag [#allocation6], %s123_s18  ;;  %s726_s29 = scalar_lea.hbm %s954_s27, 2048 }
  0x32   : > { %p727_p13 = scmp.ne.s32.totalorder %s954_s27, %s726_s29  ;;  %p728_p0 = pneg %p956_p11 }
  0x33   : > { %s731_s6 = scalar_lea.hbm %s1150_s1, 4096  ;;  %p732_p7 = scmp.lt.u32.totalorder %s954_s27, %s1150_s1 }
  0x34   : > { %p729_p3 = pnand %p728_p0, %p727_p13  ;;  %p733_p9 = scmp.lt.u32.totalorder %s731_s6, %s726_s29 }
  0x35   : > { %p735_p2 = scmp.lt.u32.totalorder %s726_s29, %s954_s27 }
  0x36   : > { %p730_p5 = pneg %p729_p3  ;;  %p734_p1 = por %p733_p9, %p732_p7 }
  0x38   : > { %p736_p4 = por %p735_p2, %p734_p1 }
  0x3a   : > { %p737_p6 = pnand %p736_p4, %p730_p5 }
  0x3c   : > { %740 = shalt.err (!%p737_p6)
}
  0x3d   : > { %s741_s18 = scalar_lea.vmem %s960_s22, 2048  ;;  %s831_s24 = smov [#allocation5]  }
  0x3e   : > { %p742_p8 = scmp.ne.s32.totalorder %s960_s22, %s741_s18  ;;  %s746_s25 = sshll.u32 %s831_s24, 4  ;;  %s747_s25 = int_to_ptr.vmem [resolvable:$false] %s746_s25 }
  0x3f   : > { %s748_s26 = scalar_lea.vmem %s747_s25, 4096  ;;  %p749_p3 = scmp.lt.s32.totalorder %s960_s22, %s747_s25 }
  0x40   : > { %p744_p10 = pnand %p742_p8, %p728_p0  ;;  %p750_p7 = scmp.lt.s32.totalorder %s748_s26, %s741_s18 }
  0x42   : > { %p745_p13 = pneg %p744_p10  ;;  %p751_p9 = por %p750_p7, %p749_p3 }
  0x44   : > { %p752_p1 = pnand %p751_p9, %p745_p13 }
  0x46   : > { %755 = shalt.err (!%p752_p1)
}
  0x47   : > { %651 = dma.hbm_to_vmem [thread:$0]  (!%p956_p11), %s954_s27, 2048, %s960_s22, %s962_s28, %s829_s4, %s829_s4, %s830_s5  }
  0x48   : > { %p1162_p0 = scmp.ne.s32.totalorder %s1157_s17, 0 }
  0x49   : > { %p1163_p5 = scmp.eq.s32.totalorder (!%p1162_p0), %s872_s13, 0 }
  0x4a   : > { %146 = sbr.rel (%p1162_p0) target bundleno = 537 (0x219), region = 28 }
  0x51   : > { %801 = dma.done.wait (%p1163_p5), [#allocation3], 2048   ;;  %p1164_p2 = pmov %p1163_p5 }
  0x52   : > { %s1000_s19 = sand.u32 1, %s818_s10   ;;  %p1165_p11 = scmp.ne.s32.totalorder %s1155_s15, 0 }
  0x53   : > { %803 = vsyncadd (%p1164_p2), [#allocation3], 4294965248  ;;  %s531_s23 = sshll.u32 %s1000_s19, 7  ;;  %s153_s29 = scalar_lea.sflag [#allocation6], %s1000_s19 }
  0x54   : > { %s1006_s4 = scalar_lea.vmem [#allocation5], %s531_s23 }
  0x55   : > { %805 = dma.done.wait (%p1165_p11), %s153_s29, 2048  }
  0x56   : > { %807 = vsyncadd (%p1165_p11), %s153_s29, 4294965248  ;;  %v180_v0 = vld [vmem:[#allocation2] sm:$0xff]  ;;  %v182_v1 = vld [vmem:[#allocation2 + $0x10] sm:$0xff]  ;;  %v228_v22 = vlaneseq  ;;  %v832_v28 = vmov 1.0|1.0   ;;  %s1080_s15 = scalar_lea.vmem [#allocation7], %s531_s23 }
  0x57   : > { %196 = vmax.index.xlane.f32.xlu0 %v180_v0  ;;  %200 = vmax.index.xlane.f32.xlu1 %v182_v1  ;;  %v181_v2 = vld [vmem:[#allocation2 + $0x8] sm:$0xff]  ;;  %v183_v3 = vld [vmem:[#allocation2 + $0x18] sm:$0xff]  ;;  %v184_v5 = vld [vmem:[#allocation2 + $0x20] sm:$0xff]  ;;  %s571_s17 = sshll.u32 %s872_s13, 11  ;;  %s437_s5 = sshll.u32 %s1080_s15, 4  ;;  %s1099_s5 = int_to_ptr.vmem [resolvable:$true] %s437_s5 }
  0x58   : > { %v185_v4 = vld [vmem:[#allocation2 + $0x28] sm:$0xff]  ;;  %v187_v6 = vld [vmem:[#allocation2 + $0x38] sm:$0xff]  ;;  %v186_v7 = vld [vmem:[#allocation2 + $0x30] sm:$0xff]  ;;  %v1016_v25 = vand.u32 127, %v228_v22  ;;  %s1097_s28 = scalar_lea.hbm %s1151_s2, %s571_s17  ;;  %s424_s13 = scalar_lea.sflag [#allocation4], %s1000_s19 }
  0x59   : > { %v189_v8 = vld [vmem:[#allocation2 + $0x48] sm:$0xff]  ;;  %v188_v9 = vld [vmem:[#allocation2 + $0x40] sm:$0xff]  ;;  %v191_v10 = vld [vmem:[#allocation2 + $0x58] sm:$0xff]  ;;  %s756_s30 = scalar_lea.vmem %s1099_s5, 2048  ;;  %s833_s3 = smov [#allocation7]  }
  0x5a   : > { %v190_v11 = vld [vmem:[#allocation2 + $0x50] sm:$0xff]  ;;  %v193_v12 = vld [vmem:[#allocation2 + $0x68] sm:$0xff]  ;;  %v192_v13 = vld [vmem:[#allocation2 + $0x60] sm:$0xff]  ;;  %p757_p4 = scmp.ne.s32.totalorder %s1099_s5, %s756_s30  ;;  %s760_s6 = sshll.u32 %s833_s3, 4  ;;  %s761_s6 = int_to_ptr.vmem [resolvable:$false] %s760_s6 }
  0x5b   : > { %198 = vmax.index.xlane.f32.xlu0 %v181_v2  ;;  %202 = vmax.index.xlane.f32.xlu1 %v183_v3  ;;  %v195_v14 = vld [vmem:[#allocation2 + $0x78] sm:$0xff]  ;;  %v194_v15 = vld [vmem:[#allocation2 + $0x70] sm:$0xff]  ;;  %v286_v16 = vld [vmem:[%s1006_s4] sm:$0xff]  ;;  %s762_s7 = scalar_lea.vmem %s761_s6, 4096  ;;  %p763_p10 = scmp.lt.s32.totalorder %s1099_s5, %s761_s6 }
  0x5c   : > { %v287_v17 = vld [vmem:[%s1006_s4 + $0x8] sm:$0xff]  ;;  %v294_v18 = vld [vmem:[%s1006_s4 + $0x40] sm:$0xff]  ;;  %v288_v41 = vld [vmem:[%s1006_s4 + $0x10] sm:$0xff]  ;;  %p758_p6 = pnand %p757_p4, %p945_p12  ;;  %p764_p13 = scmp.lt.s32.totalorder %s762_s7, %s756_s30 }
  0x5d   : > { %v302_v19 = vpack.c.bf16 %v287_v17, %v286_v16  ;;  %v295_v20 = vld [vmem:[%s1006_s4 + $0x48] sm:$0xff]  ;;  %v289_v42 = vld [vmem:[%s1006_s4 + $0x18] sm:$0xff]  ;;  %v296_v43 = vld [vmem:[%s1006_s4 + $0x50] sm:$0xff] }
  0x5e   : > { %v306_v21 = vpack.c.bf16 %v295_v20, %v294_v18  ;;  %v297_v44 = vld [vmem:[%s1006_s4 + $0x58] sm:$0xff]  ;;  %v290_v45 = vld [vmem:[%s1006_s4 + $0x20] sm:$0xff]  ;;  %v291_v46 = vld [vmem:[%s1006_s4 + $0x28] sm:$0xff]  ;;  %v303_v49 = vpack.c.bf16 %v289_v42, %v288_v41  ;;  %p759_p8 = pneg %p758_p6  ;;  %p765_p3 = por %p764_p13, %p763_p10 }
  0x5f   : > { %206 = vmax.index.xlane.f32.xlu1 %v185_v4  ;;  %204 = vmax.index.xlane.f32.xlu0 %v184_v5  ;;  %v298_v47 = vld [vmem:[%s1006_s4 + $0x60] sm:$0xff]  ;;  %v299_v48 = vld [vmem:[%s1006_s4 + $0x68] sm:$0xff]  ;;  %v307_v50 = vpack.c.bf16 %v297_v44, %v296_v43  ;;  %v304_v51 = vpack.c.bf16 %v291_v46, %v290_v45  ;;  %v292_v53 = vld [vmem:[%s1006_s4 + $0x30] sm:$0xff] }
  0x60   : > { %604 = vmatprep.mubr.bf16.mxu0 %v302_v19  ;;  %612 = vmatprep.mubr.bf16.mxu1 %v306_v21  ;;  %v308_v52 = vpack.c.bf16 %v299_v48, %v298_v47  ;;  %v293_v54 = vld [vmem:[%s1006_s4 + $0x38] sm:$0xff]  ;;  %v300_v55 = vld [vmem:[%s1006_s4 + $0x70] sm:$0xff]  ;;  %p766_p7 = pnand %p765_p3, %p759_p8 }
  0x61   : > { %v301_v56 = vld [vmem:[%s1006_s4 + $0x78] sm:$0xff]  ;;  %v305_v57 = vpack.c.bf16 %v293_v54, %v292_v53 }
  0x62   : > { %v309_v58 = vpack.c.bf16 %v301_v56, %v300_v55 }
  0x63   : > { %210 = vmax.index.xlane.f32.xlu1 %v187_v6  ;;  %208 = vmax.index.xlane.f32.xlu0 %v186_v7 }
  0x67   : > { %214 = vmax.index.xlane.f32.xlu1 %v189_v8  ;;  %212 = vmax.index.xlane.f32.xlu0 %v188_v9 }
  0x6b   : > { %218 = vmax.index.xlane.f32.xlu1 %v191_v10  ;;  %216 = vmax.index.xlane.f32.xlu0 %v190_v11 }
  0x6f   : > { %222 = vmax.index.xlane.f32.xlu1 %v193_v12  ;;  %220 = vmax.index.xlane.f32.xlu0 %v192_v13 }
  0x73   : > { %226 = vmax.index.xlane.f32.xlu1 %v195_v14  ;;  %224 = vmax.index.xlane.f32.xlu0 %v194_v15 }
  0xe4   : > { %v197_v23 = vpop.xlane.xlu0 %196  ;;  %v201_v24 = vpop.xlane.xlu1 %200 }
  0xe5   : > { %vm232_vm0 = vcmp.eq.s32.totalorder %v1016_v25, %v201_v24  ;;  %vm230_vm1 = vcmp.eq.s32.totalorder %v1016_v25, %v197_v23 }
  0xe8   : > { %v199_v26 = vpop.xlane.xlu0 %198  ;;  %v203_v27 = vpop.xlane.xlu1 %202 }
  0xe9   : > { %vm231_vm2 = vcmp.eq.s32.totalorder %v1016_v25, %v199_v26  ;;  %vm233_vm3 = vcmp.eq.s32.totalorder %v1016_v25, %v203_v27 }
  0xea   : > { %vm549_vm4 = vmpackc.low %vm231_vm2, %vm230_vm1 }
  0xeb   : > { %588 = vmatprep.subr.msk.bf16.mxu0 %vm549_vm4, %v832_v28  ;;  %620 = vmatprep.subr.msk.bf16.mxu1 %vm549_vm4, %v832_v28  ;;  %vm551_vm5 = vmpackc.low %vm233_vm3, %vm232_vm0 }
  0xec   : > { %589 = vmatpush3.bf16.xpose.msk.msra.mxu0 %vm549_vm4, %v832_v28  ;;  %628 = vmatpush3.bf16.xpose.msk.msra.mxu1 %vm549_vm4, %v832_v28  ;;  %v207_v29 = vpop.xlane.xlu1 %206  ;;  %v205_v30 = vpop.xlane.xlu0 %204 }
  0xed   : > { %590 = vmatprep.subr.msk.bf16.mxu0 %vm551_vm5, %v832_v28  ;;  %621 = vmatprep.subr.msk.bf16.mxu1 %vm551_vm5, %v832_v28  ;;  %vm235_vm6 = vcmp.eq.s32.totalorder %v1016_v25, %v207_v29  ;;  %vm234_vm7 = vcmp.eq.s32.totalorder %v1016_v25, %v205_v30 }
  0xee   : > { %vm553_vm8 = vmpackc.low %vm235_vm6, %vm234_vm7 }
  0xf0   : > { %v211_v31 = vpop.xlane.xlu1 %210  ;;  %v209_v32 = vpop.xlane.xlu0 %208 }
  0xf1   : > { %vm237_vm9 = vcmp.eq.s32.totalorder %v1016_v25, %v211_v31  ;;  %vm236_vm10 = vcmp.eq.s32.totalorder %v1016_v25, %v209_v32 }
  0xf2   : > { %vm555_vm11 = vmpackc.low %vm237_vm9, %vm236_vm10 }
  0xf4   : > { %591 = vmatpush3.bf16.xpose.msk.msra.mxu0 %vm551_vm5, %v832_v28  ;;  %629 = vmatpush3.bf16.xpose.msk.msra.mxu1 %vm551_vm5, %v832_v28  ;;  %v215_v33 = vpop.xlane.xlu1 %214  ;;  %v213_v34 = vpop.xlane.xlu0 %212 }
  0xf5   : > { %592 = vmatprep.subr.msk.bf16.mxu0 %vm553_vm8, %v832_v28  ;;  %622 = vmatprep.subr.msk.bf16.mxu1 %vm553_vm8, %v832_v28  ;;  %vm239_vm12 = vcmp.eq.s32.totalorder %v1016_v25, %v215_v33  ;;  %vm238_vm13 = vcmp.eq.s32.totalorder %v1016_v25, %v213_v34 }
  0xf6   : > { %vm557_vm14 = vmpackc.low %vm239_vm12, %vm238_vm13 }
  0xf8   : > { %v219_v35 = vpop.xlane.xlu1 %218  ;;  %v217_v36 = vpop.xlane.xlu0 %216 }
  0xf9   : > { %vm241_vm15 = vcmp.eq.s32.totalorder %v1016_v25, %v219_v35  ;;  %vm240_vm0 = vcmp.eq.s32.totalorder %v1016_v25, %v217_v36 }
  0xfa   : > { %vm559_vm1 = vmpackc.low %vm241_vm15, %vm240_vm0 }
  0xfc   : > { %593 = vmatpush3.bf16.xpose.msk.msra.mxu0 %vm553_vm8, %v832_v28  ;;  %630 = vmatpush3.bf16.xpose.msk.msra.mxu1 %vm553_vm8, %v832_v28  ;;  %v223_v37 = vpop.xlane.xlu1 %222  ;;  %v221_v38 = vpop.xlane.xlu0 %220 }
  0xfd   : > { %594 = vmatprep.subr.msk.bf16.mxu0 %vm555_vm11, %v832_v28  ;;  %623 = vmatprep.subr.msk.bf16.mxu1 %vm555_vm11, %v832_v28  ;;  %vm243_vm2 = vcmp.eq.s32.totalorder %v1016_v25, %v223_v37  ;;  %vm242_vm3 = vcmp.eq.s32.totalorder %v1016_v25, %v221_v38 }
  0xfe   : > { %vm561_vm4 = vmpackc.low %vm243_vm2, %vm242_vm3 }
 0x100   : > { %v227_v39 = vpop.xlane.xlu1 %226  ;;  %v225_v40 = vpop.xlane.xlu0 %224 }
 0x101   : > { %vm245_vm5 = vcmp.eq.s32.totalorder %v1016_v25, %v227_v39  ;;  %vm244_vm6 = vcmp.eq.s32.totalorder %v1016_v25, %v225_v40 }
 0x102   : > { %vm563_vm7 = vmpackc.low %vm245_vm5, %vm244_vm6 }
 0x104   : > { %595 = vmatpush3.bf16.xpose.msk.msra.mxu0 %vm555_vm11, %v832_v28  ;;  %631 = vmatpush3.bf16.xpose.msk.msra.mxu1 %vm555_vm11, %v832_v28 }
 0x105   : > { %596 = vmatprep.subr.msk.bf16.mxu0 %vm557_vm14, %v832_v28  ;;  %624 = vmatprep.subr.msk.bf16.mxu1 %vm557_vm14, %v832_v28 }
 0x10c   : > { %597 = vmatpush3.bf16.xpose.msk.msra.mxu0 %vm557_vm14, %v832_v28  ;;  %632 = vmatpush3.bf16.xpose.msk.msra.mxu1 %vm557_vm14, %v832_v28 }
 0x10d   : > { %598 = vmatprep.subr.msk.bf16.mxu0 %vm559_vm1, %v832_v28  ;;  %625 = vmatprep.subr.msk.bf16.mxu1 %vm559_vm1, %v832_v28 }
 0x114   : > { %599 = vmatpush3.bf16.xpose.msk.msra.mxu0 %vm559_vm1, %v832_v28  ;;  %633 = vmatpush3.bf16.xpose.msk.msra.mxu1 %vm559_vm1, %v832_v28 }
 0x115   : > { %600 = vmatprep.subr.msk.bf16.mxu0 %vm561_vm4, %v832_v28  ;;  %626 = vmatprep.subr.msk.bf16.mxu1 %vm561_vm4, %v832_v28 }
 0x11c   : > { %601 = vmatpush3.bf16.xpose.msk.msra.mxu0 %vm561_vm4, %v832_v28  ;;  %634 = vmatpush3.bf16.xpose.msk.msra.mxu1 %vm561_vm4, %v832_v28 }
 0x11d   : > { %602 = vmatprep.subr.msk.bf16.mxu0 %vm563_vm7, %v832_v28  ;;  %627 = vmatprep.subr.msk.bf16.mxu1 %vm563_vm7, %v832_v28 }
 0x124   : > { %603 = vmatpush3.bf16.xpose.msk.msra.mxu0 %vm563_vm7, %v832_v28  ;;  %635 = vmatpush3.bf16.xpose.msk.msra.mxu1 %vm563_vm7, %v832_v28 }
 0x12b   : > { %605 = vmatmul.mubr.bf16.vlgmr.msra.gmra.mrb[0].mxu0 %v303_v49  ;;  %613 = vmatmul.mubr.bf16.vlgmr.msra.gmra.mrb[0].mxu1 %v307_v50 }
 0x12c   : > { %608 = vmatprep.mubr.bf16.mxu0 %v304_v51  ;;  %616 = vmatprep.mubr.bf16.mxu1 %v308_v52 }
 0x133   : > { %609 = vmatmul.mubr.bf16.gmra.mrb[4].mxu0 %v305_v57  ;;  %617 = vmatmul.mubr.bf16.gmra.mrb[4].mxu1 %v309_v58 }
 0x1fe   : > { %v606_v59 = vpop.f32.mrb[0].mxu0  ;;  %v614_v60 = vpop.f32.mrb[0].mxu1 }
 0x1ff   : > { %409 = vst [vmem:[%s1080_s15 + $0x10] sm:$0xff] %v606_v59  ;;  %417 = vst [vmem:[%s1080_s15 + $0x50] sm:$0xff] %v614_v60  ;;  %v344_v61 = vpop.f32.mrb[1].mxu0  ;;  %v376_v62 = vpop.f32.mrb[1].mxu1 }
 0x200   : > { %407 = vst [vmem:[%s1080_s15] sm:$0xff] %v344_v61  ;;  %415 = vst [vmem:[%s1080_s15 + $0x40] sm:$0xff] %v376_v62  ;;  %v607_v63 = vpop.f32.mrb[2].mxu0  ;;  %v615_v0 = vpop.f32.mrb[2].mxu1 }
 0x201   : > { %410 = vst [vmem:[%s1080_s15 + $0x18] sm:$0xff] %v607_v63  ;;  %418 = vst [vmem:[%s1080_s15 + $0x58] sm:$0xff] %v615_v0  ;;  %v347_v1 = vpop.f32.mrb[3].mxu0  ;;  %v379_v2 = vpop.f32.mrb[3].mxu1 }
 0x202   : > { %408 = vst [vmem:[%s1080_s15 + $0x8] sm:$0xff] %v347_v1  ;;  %416 = vst [vmem:[%s1080_s15 + $0x48] sm:$0xff] %v379_v2 }
 0x206   : > { %v610_v3 = vpop.f32.mrb[4].mxu0  ;;  %v618_v4 = vpop.f32.mrb[4].mxu1 }
 0x207   : > { %413 = vst [vmem:[%s1080_s15 + $0x30] sm:$0xff] %v610_v3  ;;  %421 = vst [vmem:[%s1080_s15 + $0x70] sm:$0xff] %v618_v4  ;;  %v360_v5 = vpop.f32.mrb[5].mxu0  ;;  %v392_v6 = vpop.f32.mrb[5].mxu1 }
 0x208   : > { %411 = vst [vmem:[%s1080_s15 + $0x20] sm:$0xff] %v360_v5  ;;  %419 = vst [vmem:[%s1080_s15 + $0x60] sm:$0xff] %v392_v6  ;;  %v611_v7 = vpop.f32.mrb[6].mxu0  ;;  %v619_v8 = vpop.f32.mrb[6].mxu1 }
 0x209   : > { %414 = vst [vmem:[%s1080_s15 + $0x38] sm:$0xff] %v611_v7  ;;  %422 = vst [vmem:[%s1080_s15 + $0x78] sm:$0xff] %v619_v8  ;;  %v363_v9 = vpop.f32.mrb[7].mxu0  ;;  %v395_v10 = vpop.f32.mrb[7].mxu1 }
 0x20a   : > { %412 = vst [vmem:[%s1080_s15 + $0x28] sm:$0xff] %v363_v9  ;;  %420 = vst [vmem:[%s1080_s15 + $0x68] sm:$0xff] %v395_v10 }
 0x20b   : > { %769 = shalt.err (!%p766_p7)
}
 0x20c   : > { %s770_s20 = scalar_lea.hbm %s1097_s28, 2048  ;;  %s774_s25 = scalar_lea.hbm %s1151_s2, 4096 }
 0x20d   : > { %p771_p9 = scmp.ne.s32.totalorder %s1097_s28, %s770_s20  ;;  %p775_p5 = scmp.lt.u32.totalorder %s1097_s28, %s1151_s2 }
 0x20e   : > { %p776_p2 = scmp.lt.u32.totalorder %s774_s25, %s770_s20  ;;  %p778_p4 = scmp.lt.u32.totalorder %s770_s20, %s1097_s28 }
 0x20f   : > { %p772_p1 = pnand %p771_p9, %p945_p12 }
 0x210   : > { %p777_p11 = por %p776_p2, %p775_p5 }
 0x211   : > { %p773_p0 = pneg %p772_p1 }
 0x212   : > { %p779_p6 = por %p778_p4, %p777_p11 }
 0x214   : > { %p780_p8 = pnand %p779_p6, %p773_p0 }
 0x216   : > { %783 = shalt.err (!%p780_p8)
}
 0x217   : > { %s834_s29 = smov 128   ;;  %s835_s4 = smov 8  }
 0x218   : > { %642 = dma.vmem_to_hbm [thread:$0]  (%p945_p12), %s1099_s5, 2048, %s1097_s28, %s424_s13, %s834_s29, %s834_s29, %s835_s4  }
 0x219 PF: > { %s452_s15 = sand.u32 1, %s814_s9   ;;  %p1166_p10 = scmp.ne.s32.totalorder %s1156_s16, 0 }
 0x21a   : > { %p1167_p13 = scmp.ge.s32.totalorder %s826_s12, 2  ;;  %s453_s17 = scalar_lea.sflag [#allocation4], %s452_s15 }
 0x21c   : > { %p653_p3 = pnand %p1167_p13, %p1166_p10 }
 0x21e   : > { %809 = dma.done.wait (!%p653_p3), %s453_s17, 2048  }
 0x21f   : > { %811 = vsyncadd (!%p653_p3), %s453_s17, 4294965248  ;;  %p16_p7 = scmp.ge.s32.totalorder %s907_s21, 4   ;;  %s1168_s9 = smov %s818_s10 }
 0x220   : > { %s1169_s10 = smov %s822_s11  ;;  %s1170_s11 = smov %s941_s8 }
 0x221   : > { %s1171_s12 = smov %s907_s21  ;;  %18 = sbr.rel (!%p16_p7) target bundleno = 6 (0x6), region = 78 }
 0x228   :  { %458 = vsyncpa [#allocation3], 1 }
 0x229   :  { %460 = vsyncpa [#allocation3 + $0x1], 1 }
 0x22a   :  { %461 = vsyncpa [#allocation6], 1 }
 0x22b   :  { %463 = vsyncpa [#allocation6 + $0x1], 1 }
 0x22c   :  { %464 = vsyncpa [#allocation4], 1 }
 0x22d   :  { %466 = vsyncpa [#allocation4 + $0x1], 1 }

</bundles_post_ra>
